<compile_context>
chip_gen: v6e
topology: v6e:2x2x1
jax: 0.10.0
libtpu: 0.0.40
codegen_flags: <defaults>
</compile_context>

<pallas_src>
import functools
import math
import re

import jax
import jax.numpy as jnp
from jax.experimental import pallas as pl
from jax.experimental.pallas import tpu as pltpu

_LANE = 128
_SMALL_N = 32 * 1024                 # below this, plain XLA beats kernel launch cost
_BIAS_RESIDENT_BYTES = 512 * 1024    # cap for a resident (non-tiled) broadcast operand


def _cdiv(a, b):
    return -(-a // b)


def _round_up(a, b):
    return _cdiv(a, b) * b


def _sublane_rows(dtype):
    itemsize = jnp.dtype(dtype).itemsize
    if itemsize >= 4:
        return 8
    if itemsize == 2:
        return 16
    return 32


def _tpu_generation():
    """Best-effort TPU generation (5, 6, 7, ...) from the device kind string."""
    try:
        kind = jax.devices()[0].device_kind
    except Exception:
        return None
    m = re.search(r"(\d+)", str(kind))
    return int(m.group(1)) if m else None


def _max_block_bytes(gen):
    # 4 MiB/array on v6e/v7x; 2 MiB on v5e/unknown (fits default scoped VMEM).
    if gen is not None and gen >= 6:
        return 4 * 1024 * 1024
    return 2 * 1024 * 1024


def _pick_lane_width(n):
    """Largest of {512, 256, 128} dividing n, else None."""
    for w in (512, 256, 128):
        if n % w == 0:
            return w
    return None


def _pick_tile(total, granule, max_tile, force_split):
    """Tile size along a dimension of extent `total`.

    Returns a multiple of `granule` (or the full extent).  Prefers divisors of
    `total` (no ragged final block); otherwise uses the largest tile and lets
    Pallas mask the ragged tail.  `force_split` (v7x) targets an even step
    count so the "parallel" grid axis shards evenly across both TensorCores.
    """
    max_tile = max(granule, (max_tile // granule) * granule)
    if force_split and total > granule:
        steps = max(2, _cdiv(total, max_tile))
        if steps % 2:
            steps += 1
        return max(granule, min(max_tile, _round_up(_cdiv(total, steps), granule)))
    if total <= max_tile:
        return total
    t = max_tile
    lo = max(granule, max_tile // 2)
    while t >= lo:
        if total % t == 0:
            return t
        t -= granule
    return max_tile  # ragged final block; Pallas masks the tail writes


def _binary_kernel(op, a_ref, b_ref, o_ref):
    # Blocks may have different (broadcast-compatible) shapes: a full tile vs a
    # resident (1,1) scalar or (tail_rows, w) bias block.  jnp broadcasting
    # inside the kernel does the splat -- no HBM-side broadcast materialization.
    o_ref[...] = op(a_ref[...], b_ref[...]).astype(o_ref.dtype)


def _pallas_elementwise(op, operands, in_specs, out_spec, out_slab_shape,
                        out_dtype, grid):
    return pl.pallas_call(
        functools.partial(_binary_kernel, op),
        out_shape=jax.ShapeDtypeStruct(out_slab_shape, out_dtype),
        grid_spec=pltpu.PrefetchScalarGridSpec(
            num_scalar_prefetch=0,
            grid=grid,
            in_specs=in_specs,
            out_specs=out_spec,
        ),
        compiler_params=pltpu.CompilerParams(
            dimension_semantics=("parallel",),
        ),
    )(*operands)


@functools.partial(jax.jit, static_argnames=("op",))
def binary_op(x0, x1, op=jnp.add):
    """TorchBinaryOp.forward(x0, x1) == op(x0, x1) with numpy-style broadcasting."""
    x0 = jnp.asarray(x0)
    x1 = jnp.asarray(x1)

    out_shape = jnp.broadcast_shapes(x0.shape, x1.shape)
    out_dtype = jax.eval_shape(
        op,
        jax.ShapeDtypeStruct((), x0.dtype),
        jax.ShapeDtypeStruct((), x1.dtype),
    ).dtype

    n = math.prod(out_shape) if out_shape else 1
    if n == 0:
        return jnp.zeros(out_shape, out_dtype)
    if n < _SMALL_N:
        # Tiny tensors: fixed pallas_call launch + wrapper glue dominates.
        return op(x0, x1).astype(out_dtype)

    gen = _tpu_generation()
    force_split = gen is not None and gen >= 7          # 2 TensorCores / chip
    max_block = _max_block_bytes(gen)
    itemsize = max(x0.dtype.itemsize, x1.dtype.itemsize,
                   jnp.dtype(out_dtype).itemsize)
    sub = max(_sublane_rows(x0.dtype), _sublane_rows(x1.dtype),
              _sublane_rows(out_dtype))

    def kind(x):
        if x.size == 1:
            return "scalar"
        if tuple(x.shape) == tuple(out_shape):
            return "full"
        return "bcast"

    xs = [x0, x1]
    kinds = [kind(x0), kind(x1)]

    # ---------------- bias-style broadcast path ------------------------------
    # One operand covers the full output; the other broadcasts only over the
    # leading output dims.  The small operand stays a resident VMEM block.
    if kinds.count("bcast") == 1 and kinds.count("full") == 1:
        bi = kinds.index("bcast")
        xb = xs[bi]
        s_aligned = (1,) * (len(out_shape) - xb.ndim) + tuple(xb.shape)
        k = 0
        while k < len(out_shape) and s_aligned[k] == 1:
            k += 1
        tail_shape = out_shape[k:]
        tail_n = math.prod(tail_shape)
        lead = math.prod(out_shape[:k])
        w = _pick_lane_width(tail_n)
        if k > 0 and w is not None and tail_n * itemsize <= _BIAS_RESIDENT_BYTES:
            tail_rows = tail_n // w
            # Any *internal* broadcast dims of the small operand are expanded
            # here, but that costs at most _BIAS_RESIDENT_BYTES (not n).
            xb_slab = jnp.broadcast_to(
                xb.reshape(s_aligned[k:]), tail_shape).reshape(tail_rows, w)
            xf_slab = xs[1 - bi].reshape(lead, tail_rows, w)

            bytes_per_lead = tail_n * itemsize
            tl = _pick_tile(lead, 1, max(1, max_block // bytes_per_lead),
                            force_split)
            grid = (_cdiv(lead, tl),)

            full_spec = pl.BlockSpec((tl, tail_rows, w), lambda i: (i, 0, 0))
            bias_spec = pl.BlockSpec((tail_rows, w), lambda i: (0, 0))
            operands = [None, None]
            in_specs = [None, None]
            operands[bi] = xb_slab
            operands[1 - bi] = xf_slab
            in_specs[bi] = bias_spec
            in_specs[1 - bi] = full_spec

            out3 = _pallas_elementwise(
                op, operands, in_specs,
                pl.BlockSpec((tl, tail_rows, w), lambda i: (i, 0, 0)),
                (lead, tail_rows, w), out_dtype, grid)
            return out3.reshape(out_shape)
        # else: fall through to the flat path (broadcast materialized below).

    # ---------------- flat path ----------------------------------------------
    # TODO(synk): non-scalar broadcasts that are not suffix/bias-style (or two
    # mutually-broadcasting inputs) are still materialized by XLA before the
    # kernel.
    w = _pick_lane_width(n)
    if w is None:
        # Rare: n not divisible by 128 -> padded-slab fallback (full copy).
        # TODO(synk): express this as a ragged 1-D block instead of padding.
        w = _LANE
        n_pad = _round_up(n, w)
    else:
        n_pad = n
    rows = n_pad // w

    max_tm = max(sub, (max_block // (w * itemsize)) // sub * sub)
    tm = _pick_tile(rows, sub, max_tm, force_split)
    grid = (_cdiv(rows, tm),)

    full_spec = pl.BlockSpec((tm, w), lambda i: (i, 0))
    scalar_spec = pl.BlockSpec((1, 1), lambda i: (0, 0))

    operands = []
    in_specs = []
    for x, knd in zip(xs, kinds):
        if knd == "scalar":
            # Resident (1,1) VMEM block; splat happens inside the kernel.
            operands.append(x.reshape(1, 1))
            in_specs.append(scalar_spec)
            continue
        if knd == "bcast":
            x = jnp.broadcast_to(x, out_shape)        # materialized fallback
        flat = x.reshape(-1)
        if n_pad != n:
            # pad with 1 so ops like divide stay finite in the (discarded) tail
            flat = jnp.pad(flat, (0, n_pad - n), constant_values=1)
        operands.append(flat.reshape(rows, w))
        in_specs.append(full_spec)

    out2 = _pallas_elementwise(
        op, operands, in_specs,
        pl.BlockSpec((tm, w), lambda i: (i, 0)),
        (rows, w), out_dtype, grid)

    if n_pad != n:
        return out2.reshape(-1)[:n].reshape(out_shape)
    return out2.reshape(out_shape)


if __name__ == "__main__":
    key = jax.random.PRNGKey(0)
    k0, k1, k2, k3 = jax.random.split(key, 4)

    ok = True

    def _check(out, ref, atol=1e-5, rtol=1e-5):
        global ok
        out = jax.block_until_ready(out)
        ref = jax.block_until_ready(ref)
        if out.shape != ref.shape or out.dtype != ref.dtype:
            ok = False
        elif not bool(jnp.allclose(out, ref, atol=atol, rtol=rtol)):
            ok = False

    ops = (jnp.add, jnp.subtract, jnp.multiply, jnp.divide)

    # Kernel path, full x full (flat path): (2, 4, 64, 128)
    a = jax.random.normal(k0, (2, 4, 64, 128), dtype=jnp.float32)
    b = jax.random.uniform(k1, (2, 4, 64, 128), minval=0.5, maxval=2.5,
                           dtype=jnp.float32)
    for op in ops:
        _check(binary_op(a, b, op=op), op(a, b))

    # Kernel path, bias-style broadcast (resident VMEM block): (4, 1, 128)
    bias = jax.random.uniform(k2, (4, 1, 128), minval=0.5, maxval=2.5,
                              dtype=jnp.float32)
    for op in ops:
        _check(binary_op(a, bias, op=op), op(a, bias))
    for op in (jnp.subtract, jnp.divide):   # order-sensitive, reversed operands
        _check(binary_op(bias, b, op=op), op(bias, b))

    # Kernel path, scalar operand (resident (1,1) block, no HBM broadcast).
    s = jnp.float32(3.0)
    for op in ops:
        _check(binary_op(a, s, op=op), op(a, s))

    # Integer inputs: true-division must produce a float output.
    ia = jax.random.randint(k0, (2, 4, 64, 128), -20, 20, dtype=jnp.int32)
    ib = jax.random.randint(k1, (4, 1, 128), 1, 20, dtype=jnp.int32)
    for op in (jnp.add, jnp.multiply, jnp.divide):
        _check(binary_op(ia, ib, op=op), op(ia, ib))

    # Small shapes: exercises the small-n fast path.
    xs0 = jax.random.normal(k3, (2, 4, 16, 16), dtype=jnp.float32)
    xs1 = jax.random.normal(k2, (4, 1, 16), dtype=jnp.float32) + 2.0
    for op in ops:
        _check(binary_op(xs0, xs1, op=op), op(xs0, xs1))

    print("KERNEL_OK" if ok else "KERNEL_MISMATCH")
</pallas_src>

<mosaic_0001>
module attributes {stable_mosaic.version = 11 : i64} {
  func.func @_binary_kernel(%arg0: i32, %arg1: memref<128x512xf32, #tpu.memory_space<vmem>>, %arg2: memref<128x512xf32, #tpu.memory_space<vmem>>, %arg3: memref<128x512xf32, #tpu.memory_space<vmem>>) attributes {dimension_semantics = [#tpu.dimension_semantics<parallel>], iteration_bounds = array<i64: 1>, scalar_prefetch = 0 : i64, scratch_operands = 0 : i64, tpu.core_type = #tpu.core_type<tc>, window_params = [{transform_indices = @transform_0, window_bounds = array<i64: 128, 512>}, {transform_indices = @transform_1, window_bounds = array<i64: 128, 512>}, {transform_indices = @transform_2, window_bounds = array<i64: 128, 512>}]} {
    %c0 = arith.constant 0 : index
    %c0_0 = arith.constant 0 : index
    %0 = vector.load %arg1[%c0, %c0_0] : memref<128x512xf32, #tpu.memory_space<vmem>>, vector<128x512xf32>
    %c0_1 = arith.constant 0 : index
    %c0_2 = arith.constant 0 : index
    %1 = vector.load %arg2[%c0_1, %c0_2] : memref<128x512xf32, #tpu.memory_space<vmem>>, vector<128x512xf32>
    %2 = arith.addf %0, %1 : vector<128x512xf32>
    %c0_3 = arith.constant 0 : index
    %c0_4 = arith.constant 0 : index
    %3 = vector.load %arg3[%c0_3, %c0_4] : memref<128x512xf32, #tpu.memory_space<vmem>>, vector<128x512xf32>
    tpu.vector_store %arg3[%c0_3, %c0_4], %2 {strides = array<i32>} : memref<128x512xf32, #tpu.memory_space<vmem>>, vector<128x512xf32>,
    return
  }
  func.func @transform_0(%arg0: i32) -> (i32, i32) {
    %c0_i32 = arith.constant 0 : i32
    %c0_i32_0 = arith.constant 0 : i32
    return %arg0, %c0_i32 : i32, i32
  }
  func.func @transform_1(%arg0: i32) -> (i32, i32) {
    %c0_i32 = arith.constant 0 : i32
    %c0_i32_0 = arith.constant 0 : i32
    return %arg0, %c0_i32 : i32, i32
  }
  func.func @transform_2(%arg0: i32) -> (i32, i32) {
    %c0_i32 = arith.constant 0 : i32
    %c0_i32_0 = arith.constant 0 : i32
    return %arg0, %c0_i32 : i32, i32
  }
}

</mosaic_0001>

<bundles_post_ra>
// kernel: binary_op.1
= control target key start
LH: loop header
LB: loop body
LE: loop exit
PB: predicated region body
PF: predicated region fallthrough
CT: control target
= control target key end

     0   :  { %s862_s0 = inlined_call_operand.vmem [shape: f32[128,512], index: 0, kind: input, shape index: {}]   ;;  %s863_s1 = inlined_call_operand.vmem [shape: f32[128,512], index: 1, kind: input, shape index: {}]   ;;  %s864_s2 = inlined_call_operand.vmem [shape: f32[128,512], index: 2, kind: output, shape index: {}]  }
   0x1   :  { %v11_v0 = vld [vmem:[%s862_s0] sm:$0xff]  ;;  %v12_v2 = vld [vmem:[%s862_s0 + $0x8] sm:$0xff]  ;;  %v13_v5 = vld [vmem:[%s862_s0 + $0x10] sm:$0xff] }
   0x2   :  { %v75_v1 = vld [vmem:[%s863_s1] sm:$0xff]  ;;  %v76_v4 = vld [vmem:[%s863_s1 + $0x8] sm:$0xff]  ;;  %v77_v6 = vld [vmem:[%s863_s1 + $0x10] sm:$0xff] }
   0x3   :  { %v139_v3 = vadd.f32 %v75_v1, %v11_v0  ;;  %v140_v7 = vadd.f32 %v76_v4, %v12_v2  ;;  %v141_v8 = vadd.f32 %v77_v6, %v13_v5  ;;  %v14_v9 = vld [vmem:[%s862_s0 + $0x18] sm:$0xff]  ;;  %v15_v11 = vld [vmem:[%s862_s0 + $0x20] sm:$0xff]  ;;  %v16_v14 = vld [vmem:[%s862_s0 + $0x28] sm:$0xff] }
   0x4   :  { %v78_v10 = vld [vmem:[%s863_s1 + $0x18] sm:$0xff]  ;;  %v79_v13 = vld [vmem:[%s863_s1 + $0x20] sm:$0xff]  ;;  %v80_v15 = vld [vmem:[%s863_s1 + $0x28] sm:$0xff] }
   0x5   :  { %203 = vst [vmem:[%s864_s2] sm:$0xff] %v139_v3  ;;  %v142_v12 = vadd.f32 %v78_v10, %v14_v9  ;;  %204 = vst [vmem:[%s864_s2 + $0x8] sm:$0xff] %v140_v7  ;;  %v143_v16 = vadd.f32 %v79_v13, %v15_v11  ;;  %v144_v17 = vadd.f32 %v80_v15, %v16_v14  ;;  %v17_v18 = vld [vmem:[%s862_s0 + $0x30] sm:$0xff]  ;;  %v18_v20 = vld [vmem:[%s862_s0 + $0x38] sm:$0xff] }
   0x6   :  { %205 = vst [vmem:[%s864_s2 + $0x10] sm:$0xff] %v141_v8  ;;  %v81_v19 = vld [vmem:[%s863_s1 + $0x30] sm:$0xff]  ;;  %v82_v22 = vld [vmem:[%s863_s1 + $0x38] sm:$0xff]  ;;  %v19_v23 = vld [vmem:[%s862_s0 + $0x40] sm:$0xff] }
   0x7   :  { %206 = vst [vmem:[%s864_s2 + $0x18] sm:$0xff] %v142_v12  ;;  %v145_v21 = vadd.f32 %v81_v19, %v17_v18  ;;  %v83_v24 = vld [vmem:[%s863_s1 + $0x40] sm:$0xff]  ;;  %207 = vst [vmem:[%s864_s2 + $0x20] sm:$0xff] %v143_v16  ;;  %v146_v25 = vadd.f32 %v82_v22, %v18_v20  ;;  %v20_v27 = vld [vmem:[%s862_s0 + $0x48] sm:$0xff] }
   0x8   :  { %208 = vst [vmem:[%s864_s2 + $0x28] sm:$0xff] %v144_v17  ;;  %v147_v26 = vadd.f32 %v83_v24, %v19_v23  ;;  %v84_v28 = vld [vmem:[%s863_s1 + $0x48] sm:$0xff]  ;;  %v21_v29 = vld [vmem:[%s862_s0 + $0x50] sm:$0xff]  ;;  %v22_v32 = vld [vmem:[%s862_s0 + $0x58] sm:$0xff] }
   0x9   :  { %209 = vst [vmem:[%s864_s2 + $0x30] sm:$0xff] %v145_v21  ;;  %v148_v30 = vadd.f32 %v84_v28, %v20_v27  ;;  %v85_v31 = vld [vmem:[%s863_s1 + $0x50] sm:$0xff]  ;;  %v86_v33 = vld [vmem:[%s863_s1 + $0x58] sm:$0xff]  ;;  %210 = vst [vmem:[%s864_s2 + $0x38] sm:$0xff] %v146_v25 }
   0xa   :  { %211 = vst [vmem:[%s864_s2 + $0x40] sm:$0xff] %v147_v26  ;;  %v149_v34 = vadd.f32 %v85_v31, %v21_v29  ;;  %v150_v35 = vadd.f32 %v86_v33, %v22_v32  ;;  %v23_v36 = vld [vmem:[%s862_s0 + $0x60] sm:$0xff]  ;;  %v24_v38 = vld [vmem:[%s862_s0 + $0x68] sm:$0xff]  ;;  %v25_v41 = vld [vmem:[%s862_s0 + $0x70] sm:$0xff] }
   0xb   :  { %v87_v37 = vld [vmem:[%s863_s1 + $0x60] sm:$0xff]  ;;  %212 = vst [vmem:[%s864_s2 + $0x48] sm:$0xff] %v148_v30  ;;  %v88_v40 = vld [vmem:[%s863_s1 + $0x68] sm:$0xff]  ;;  %v89_v42 = vld [vmem:[%s863_s1 + $0x70] sm:$0xff] }
   0xc   :  { %v151_v39 = vadd.f32 %v87_v37, %v23_v36  ;;  %213 = vst [vmem:[%s864_s2 + $0x50] sm:$0xff] %v149_v34  ;;  %214 = vst [vmem:[%s864_s2 + $0x58] sm:$0xff] %v150_v35  ;;  %v152_v43 = vadd.f32 %v88_v40, %v24_v38  ;;  %v153_v44 = vadd.f32 %v89_v42, %v25_v41  ;;  %v26_v45 = vld [vmem:[%s862_s0 + $0x78] sm:$0xff]  ;;  %v27_v47 = vld [vmem:[%s862_s0 + $0x80] sm:$0xff] }
   0xd   :  { %v90_v46 = vld [vmem:[%s863_s1 + $0x78] sm:$0xff]  ;;  %v91_v49 = vld [vmem:[%s863_s1 + $0x80] sm:$0xff]  ;;  %v28_v50 = vld [vmem:[%s862_s0 + $0x88] sm:$0xff] }
   0xe   :  { %215 = vst [vmem:[%s864_s2 + $0x60] sm:$0xff] %v151_v39  ;;  %v154_v48 = vadd.f32 %v90_v46, %v26_v45  ;;  %v92_v51 = vld [vmem:[%s863_s1 + $0x88] sm:$0xff]  ;;  %216 = vst [vmem:[%s864_s2 + $0x68] sm:$0xff] %v152_v43  ;;  %v155_v52 = vadd.f32 %v91_v49, %v27_v47  ;;  %v29_v54 = vld [vmem:[%s862_s0 + $0x90] sm:$0xff] }
   0xf   :  { %217 = vst [vmem:[%s864_s2 + $0x70] sm:$0xff] %v153_v44  ;;  %v156_v53 = vadd.f32 %v92_v51, %v28_v50  ;;  %v93_v55 = vld [vmem:[%s863_s1 + $0x90] sm:$0xff]  ;;  %v30_v56 = vld [vmem:[%s862_s0 + $0x98] sm:$0xff]  ;;  %v31_v59 = vld [vmem:[%s862_s0 + $0xa0] sm:$0xff] }
  0x10   :  { %218 = vst [vmem:[%s864_s2 + $0x78] sm:$0xff] %v154_v48  ;;  %v157_v57 = vadd.f32 %v93_v55, %v29_v54  ;;  %v94_v58 = vld [vmem:[%s863_s1 + $0x98] sm:$0xff]  ;;  %v95_v60 = vld [vmem:[%s863_s1 + $0xa0] sm:$0xff]  ;;  %219 = vst [vmem:[%s864_s2 + $0x80] sm:$0xff] %v155_v52 }
  0x11   :  { %220 = vst [vmem:[%s864_s2 + $0x88] sm:$0xff] %v156_v53  ;;  %v158_v61 = vadd.f32 %v94_v58, %v30_v56  ;;  %v159_v62 = vadd.f32 %v95_v60, %v31_v59  ;;  %v32_v63 = vld [vmem:[%s862_s0 + $0xa8] sm:$0xff]  ;;  %v33_v1 = vld [vmem:[%s862_s0 + $0xb0] sm:$0xff]  ;;  %v34_v4 = vld [vmem:[%s862_s0 + $0xb8] sm:$0xff] }
  0x12   :  { %v96_v0 = vld [vmem:[%s863_s1 + $0xa8] sm:$0xff]  ;;  %221 = vst [vmem:[%s864_s2 + $0x90] sm:$0xff] %v157_v57  ;;  %v97_v3 = vld [vmem:[%s863_s1 + $0xb0] sm:$0xff]  ;;  %v98_v5 = vld [vmem:[%s863_s1 + $0xb8] sm:$0xff] }
  0x13   :  { %v160_v2 = vadd.f32 %v96_v0, %v32_v63  ;;  %222 = vst [vmem:[%s864_s2 + $0x98] sm:$0xff] %v158_v61  ;;  %223 = vst [vmem:[%s864_s2 + $0xa0] sm:$0xff] %v159_v62  ;;  %v161_v6 = vadd.f32 %v97_v3, %v33_v1  ;;  %v162_v7 = vadd.f32 %v98_v5, %v34_v4  ;;  %v35_v8 = vld [vmem:[%s862_s0 + $0xc0] sm:$0xff]  ;;  %v36_v10 = vld [vmem:[%s862_s0 + $0xc8] sm:$0xff] }
  0x14   :  { %v99_v9 = vld [vmem:[%s863_s1 + $0xc0] sm:$0xff]  ;;  %v100_v12 = vld [vmem:[%s863_s1 + $0xc8] sm:$0xff]  ;;  %v37_v13 = vld [vmem:[%s862_s0 + $0xd0] sm:$0xff] }
  0x15   :  { %224 = vst [vmem:[%s864_s2 + $0xa8] sm:$0xff] %v160_v2  ;;  %v163_v11 = vadd.f32 %v99_v9, %v35_v8  ;;  %v101_v14 = vld [vmem:[%s863_s1 + $0xd0] sm:$0xff]  ;;  %225 = vst [vmem:[%s864_s2 + $0xb0] sm:$0xff] %v161_v6  ;;  %v164_v15 = vadd.f32 %v100_v12, %v36_v10  ;;  %v38_v17 = vld [vmem:[%s862_s0 + $0xd8] sm:$0xff] }
  0x16   :  { %226 = vst [vmem:[%s864_s2 + $0xb8] sm:$0xff] %v162_v7  ;;  %v165_v16 = vadd.f32 %v101_v14, %v37_v13  ;;  %v102_v18 = vld [vmem:[%s863_s1 + $0xd8] sm:$0xff]  ;;  %v39_v19 = vld [vmem:[%s862_s0 + $0xe0] sm:$0xff]  ;;  %v40_v22 = vld [vmem:[%s862_s0 + $0xe8] sm:$0xff] }
  0x17   :  { %227 = vst [vmem:[%s864_s2 + $0xc0] sm:$0xff] %v163_v11  ;;  %v166_v20 = vadd.f32 %v102_v18, %v38_v17  ;;  %v103_v21 = vld [vmem:[%s863_s1 + $0xe0] sm:$0xff]  ;;  %v104_v23 = vld [vmem:[%s863_s1 + $0xe8] sm:$0xff]  ;;  %228 = vst [vmem:[%s864_s2 + $0xc8] sm:$0xff] %v164_v15 }
  0x18   :  { %229 = vst [vmem:[%s864_s2 + $0xd0] sm:$0xff] %v165_v16  ;;  %v167_v24 = vadd.f32 %v103_v21, %v39_v19  ;;  %v168_v25 = vadd.f32 %v104_v23, %v40_v22  ;;  %v41_v26 = vld [vmem:[%s862_s0 + $0xf0] sm:$0xff]  ;;  %v42_v28 = vld [vmem:[%s862_s0 + $0xf8] sm:$0xff]  ;;  %v43_v31 = vld [vmem:[%s862_s0 + $0x100] sm:$0xff] }
  0x19   :  { %v105_v27 = vld [vmem:[%s863_s1 + $0xf0] sm:$0xff]  ;;  %230 = vst [vmem:[%s864_s2 + $0xd8] sm:$0xff] %v166_v20  ;;  %v106_v30 = vld [vmem:[%s863_s1 + $0xf8] sm:$0xff]  ;;  %v107_v32 = vld [vmem:[%s863_s1 + $0x100] sm:$0xff] }
  0x1a   :  { %v169_v29 = vadd.f32 %v105_v27, %v41_v26  ;;  %231 = vst [vmem:[%s864_s2 + $0xe0] sm:$0xff] %v167_v24  ;;  %232 = vst [vmem:[%s864_s2 + $0xe8] sm:$0xff] %v168_v25  ;;  %v170_v33 = vadd.f32 %v106_v30, %v42_v28  ;;  %v171_v34 = vadd.f32 %v107_v32, %v43_v31  ;;  %v44_v35 = vld [vmem:[%s862_s0 + $0x108] sm:$0xff]  ;;  %v45_v37 = vld [vmem:[%s862_s0 + $0x110] sm:$0xff] }
  0x1b   :  { %v108_v36 = vld [vmem:[%s863_s1 + $0x108] sm:$0xff]  ;;  %v109_v39 = vld [vmem:[%s863_s1 + $0x110] sm:$0xff]  ;;  %v46_v40 = vld [vmem:[%s862_s0 + $0x118] sm:$0xff] }
  0x1c   :  { %233 = vst [vmem:[%s864_s2 + $0xf0] sm:$0xff] %v169_v29  ;;  %v172_v38 = vadd.f32 %v108_v36, %v44_v35  ;;  %v110_v41 = vld [vmem:[%s863_s1 + $0x118] sm:$0xff]  ;;  %234 = vst [vmem:[%s864_s2 + $0xf8] sm:$0xff] %v170_v33  ;;  %v173_v42 = vadd.f32 %v109_v39, %v45_v37  ;;  %v47_v44 = vld [vmem:[%s862_s0 + $0x120] sm:$0xff] }
  0x1d   :  { %235 = vst [vmem:[%s864_s2 + $0x100] sm:$0xff] %v171_v34  ;;  %v174_v43 = vadd.f32 %v110_v41, %v46_v40  ;;  %v111_v45 = vld [vmem:[%s863_s1 + $0x120] sm:$0xff]  ;;  %v48_v46 = vld [vmem:[%s862_s0 + $0x128] sm:$0xff]  ;;  %v49_v49 = vld [vmem:[%s862_s0 + $0x130] sm:$0xff] }
  0x1e   :  { %236 = vst [vmem:[%s864_s2 + $0x108] sm:$0xff] %v172_v38  ;;  %v175_v47 = vadd.f32 %v111_v45, %v47_v44  ;;  %v112_v48 = vld [vmem:[%s863_s1 + $0x128] sm:$0xff]  ;;  %v113_v50 = vld [vmem:[%s863_s1 + $0x130] sm:$0xff]  ;;  %237 = vst [vmem:[%s864_s2 + $0x110] sm:$0xff] %v173_v42 }
  0x1f   :  { %238 = vst [vmem:[%s864_s2 + $0x118] sm:$0xff] %v174_v43  ;;  %v176_v51 = vadd.f32 %v112_v48, %v48_v46  ;;  %v177_v52 = vadd.f32 %v113_v50, %v49_v49  ;;  %v50_v53 = vld [vmem:[%s862_s0 + $0x138] sm:$0xff]  ;;  %v51_v55 = vld [vmem:[%s862_s0 + $0x140] sm:$0xff]  ;;  %v52_v58 = vld [vmem:[%s862_s0 + $0x148] sm:$0xff] }
  0x20   :  { %v114_v54 = vld [vmem:[%s863_s1 + $0x138] sm:$0xff]  ;;  %239 = vst [vmem:[%s864_s2 + $0x120] sm:$0xff] %v175_v47  ;;  %v115_v57 = vld [vmem:[%s863_s1 + $0x140] sm:$0xff]  ;;  %v116_v59 = vld [vmem:[%s863_s1 + $0x148] sm:$0xff] }
  0x21   :  { %v178_v56 = vadd.f32 %v114_v54, %v50_v53  ;;  %240 = vst [vmem:[%s864_s2 + $0x128] sm:$0xff] %v176_v51  ;;  %241 = vst [vmem:[%s864_s2 + $0x130] sm:$0xff] %v177_v52  ;;  %v179_v60 = vadd.f32 %v115_v57, %v51_v55  ;;  %v180_v61 = vadd.f32 %v116_v59, %v52_v58  ;;  %v53_v62 = vld [vmem:[%s862_s0 + $0x150] sm:$0xff]  ;;  %v54_v0 = vld [vmem:[%s862_s0 + $0x158] sm:$0xff] }
  0x22   :  { %v117_v63 = vld [vmem:[%s863_s1 + $0x150] sm:$0xff]  ;;  %v118_v2 = vld [vmem:[%s863_s1 + $0x158] sm:$0xff]  ;;  %v55_v3 = vld [vmem:[%s862_s0 + $0x160] sm:$0xff] }
  0x23   :  { %242 = vst [vmem:[%s864_s2 + $0x138] sm:$0xff] %v178_v56  ;;  %v181_v1 = vadd.f32 %v117_v63, %v53_v62  ;;  %v119_v4 = vld [vmem:[%s863_s1 + $0x160] sm:$0xff]  ;;  %243 = vst [vmem:[%s864_s2 + $0x140] sm:$0xff] %v179_v60  ;;  %v182_v5 = vadd.f32 %v118_v2, %v54_v0  ;;  %v56_v7 = vld [vmem:[%s862_s0 + $0x168] sm:$0xff] }
  0x24   :  { %244 = vst [vmem:[%s864_s2 + $0x148] sm:$0xff] %v180_v61  ;;  %v183_v6 = vadd.f32 %v119_v4, %v55_v3  ;;  %v120_v8 = vld [vmem:[%s863_s1 + $0x168] sm:$0xff]  ;;  %v57_v9 = vld [vmem:[%s862_s0 + $0x170] sm:$0xff]  ;;  %v58_v12 = vld [vmem:[%s862_s0 + $0x178] sm:$0xff] }
  0x25   :  { %245 = vst [vmem:[%s864_s2 + $0x150] sm:$0xff] %v181_v1  ;;  %v184_v10 = vadd.f32 %v120_v8, %v56_v7  ;;  %v121_v11 = vld [vmem:[%s863_s1 + $0x170] sm:$0xff]  ;;  %v122_v13 = vld [vmem:[%s863_s1 + $0x178] sm:$0xff]  ;;  %246 = vst [vmem:[%s864_s2 + $0x158] sm:$0xff] %v182_v5 }
  0x26   :  { %247 = vst [vmem:[%s864_s2 + $0x160] sm:$0xff] %v183_v6  ;;  %v185_v14 = vadd.f32 %v121_v11, %v57_v9  ;;  %v186_v15 = vadd.f32 %v122_v13, %v58_v12  ;;  %v59_v16 = vld [vmem:[%s862_s0 + $0x180] sm:$0xff]  ;;  %v60_v18 = vld [vmem:[%s862_s0 + $0x188] sm:$0xff]  ;;  %v61_v21 = vld [vmem:[%s862_s0 + $0x190] sm:$0xff] }
  0x27   :  { %v123_v17 = vld [vmem:[%s863_s1 + $0x180] sm:$0xff]  ;;  %248 = vst [vmem:[%s864_s2 + $0x168] sm:$0xff] %v184_v10  ;;  %v124_v20 = vld [vmem:[%s863_s1 + $0x188] sm:$0xff]  ;;  %v125_v22 = vld [vmem:[%s863_s1 + $0x190] sm:$0xff] }
  0x28   :  { %v187_v19 = vadd.f32 %v123_v17, %v59_v16  ;;  %249 = vst [vmem:[%s864_s2 + $0x170] sm:$0xff] %v185_v14  ;;  %250 = vst [vmem:[%s864_s2 + $0x178] sm:$0xff] %v186_v15  ;;  %v188_v23 = vadd.f32 %v124_v20, %v60_v18  ;;  %v189_v24 = vadd.f32 %v125_v22, %v61_v21  ;;  %v62_v25 = vld [vmem:[%s862_s0 + $0x198] sm:$0xff]  ;;  %v63_v27 = vld [vmem:[%s862_s0 + $0x1a0] sm:$0xff] }
  0x29   :  { %v126_v26 = vld [vmem:[%s863_s1 + $0x198] sm:$0xff]  ;;  %v127_v29 = vld [vmem:[%s863_s1 + $0x1a0] sm:$0xff]  ;;  %v64_v30 = vld [vmem:[%s862_s0 + $0x1a8] sm:$0xff] }
  0x2a   :  { %251 = vst [vmem:[%s864_s2 + $0x180] sm:$0xff] %v187_v19  ;;  %v190_v28 = vadd.f32 %v126_v26, %v62_v25  ;;  %v128_v31 = vld [vmem:[%s863_s1 + $0x1a8] sm:$0xff]  ;;  %252 = vst [vmem:[%s864_s2 + $0x188] sm:$0xff] %v188_v23  ;;  %v191_v32 = vadd.f32 %v127_v29, %v63_v27  ;;  %v65_v34 = vld [vmem:[%s862_s0 + $0x1b0] sm:$0xff] }
  0x2b   :  { %253 = vst [vmem:[%s864_s2 + $0x190] sm:$0xff] %v189_v24  ;;  %v192_v33 = vadd.f32 %v128_v31, %v64_v30  ;;  %v129_v35 = vld [vmem:[%s863_s1 + $0x1b0] sm:$0xff]  ;;  %v66_v36 = vld [vmem:[%s862_s0 + $0x1b8] sm:$0xff]  ;;  %v67_v39 = vld [vmem:[%s862_s0 + $0x1c0] sm:$0xff] }
  0x2c   :  { %254 = vst [vmem:[%s864_s2 + $0x198] sm:$0xff] %v190_v28  ;;  %v193_v37 = vadd.f32 %v129_v35, %v65_v34  ;;  %v130_v38 = vld [vmem:[%s863_s1 + $0x1b8] sm:$0xff]  ;;  %v131_v40 = vld [vmem:[%s863_s1 + $0x1c0] sm:$0xff]  ;;  %255 = vst [vmem:[%s864_s2 + $0x1a0] sm:$0xff] %v191_v32 }
  0x2d   :  { %256 = vst [vmem:[%s864_s2 + $0x1a8] sm:$0xff] %v192_v33  ;;  %v194_v41 = vadd.f32 %v130_v38, %v66_v36  ;;  %v195_v42 = vadd.f32 %v131_v40, %v67_v39  ;;  %v68_v43 = vld [vmem:[%s862_s0 + $0x1c8] sm:$0xff]  ;;  %v69_v45 = vld [vmem:[%s862_s0 + $0x1d0] sm:$0xff]  ;;  %v70_v48 = vld [vmem:[%s862_s0 + $0x1d8] sm:$0xff] }
  0x2e   :  { %v132_v44 = vld [vmem:[%s863_s1 + $0x1c8] sm:$0xff]  ;;  %257 = vst [vmem:[%s864_s2 + $0x1b0] sm:$0xff] %v193_v37  ;;  %v133_v47 = vld [vmem:[%s863_s1 + $0x1d0] sm:$0xff]  ;;  %v134_v49 = vld [vmem:[%s863_s1 + $0x1d8] sm:$0xff] }
  0x2f   :  { %v196_v46 = vadd.f32 %v132_v44, %v68_v43  ;;  %258 = vst [vmem:[%s864_s2 + $0x1b8] sm:$0xff] %v194_v41  ;;  %259 = vst [vmem:[%s864_s2 + $0x1c0] sm:$0xff] %v195_v42  ;;  %v197_v50 = vadd.f32 %v133_v47, %v69_v45  ;;  %v198_v51 = vadd.f32 %v134_v49, %v70_v48  ;;  %v71_v52 = vld [vmem:[%s862_s0 + $0x1e0] sm:$0xff]  ;;  %v72_v54 = vld [vmem:[%s862_s0 + $0x1e8] sm:$0xff] }
  0x30   :  { %v135_v53 = vld [vmem:[%s863_s1 + $0x1e0] sm:$0xff]  ;;  %v136_v56 = vld [vmem:[%s863_s1 + $0x1e8] sm:$0xff]  ;;  %v73_v57 = vld [vmem:[%s862_s0 + $0x1f0] sm:$0xff] }
  0x31   :  { %260 = vst [vmem:[%s864_s2 + $0x1c8] sm:$0xff] %v196_v46  ;;  %v199_v55 = vadd.f32 %v135_v53, %v71_v52  ;;  %v137_v58 = vld [vmem:[%s863_s1 + $0x1f0] sm:$0xff]  ;;  %261 = vst [vmem:[%s864_s2 + $0x1d0] sm:$0xff] %v197_v50  ;;  %v200_v59 = vadd.f32 %v136_v56, %v72_v54  ;;  %v74_v61 = vld [vmem:[%s862_s0 + $0x1f8] sm:$0xff] }
  0x32   :  { %262 = vst [vmem:[%s864_s2 + $0x1d8] sm:$0xff] %v198_v51  ;;  %v201_v60 = vadd.f32 %v137_v58, %v73_v57  ;;  %v138_v62 = vld [vmem:[%s863_s1 + $0x1f8] sm:$0xff] }
  0x33   :  { %263 = vst [vmem:[%s864_s2 + $0x1e0] sm:$0xff] %v199_v55  ;;  %v202_v63 = vadd.f32 %v138_v62, %v74_v61  ;;  %264 = vst [vmem:[%s864_s2 + $0x1e8] sm:$0xff] %v200_v59 }
  0x34   :  { %265 = vst [vmem:[%s864_s2 + $0x1f0] sm:$0xff] %v201_v60 }
  0x35   :  { %266 = vst [vmem:[%s864_s2 + $0x1f8] sm:$0xff] %v202_v63 }

</bundles_post_ra>
